<compile_context>
chip_gen: v6e
topology: v6e:2x2x1
jax: 0.10.0
libtpu: 0.0.40
codegen_flags: <defaults>
</compile_context>

<pallas_src>
import jax
import jax.numpy as jnp
from jax.experimental import pallas as pl
from jax.experimental.pallas import tpu as pltpu

LANES = 128
ACC_ROWS = 8            # accumulator sublanes: 7 partial sums + 1 zero pad row
MAX_BLOCK_ROWS = 1024   # 1024 x 128 f32 = 512 KiB per input buffer
NUM_CORES = 2           # leading "parallel" axis (v7x megacore; no-op on 1-TC chips)


def _make_kernel(block_rows, n_inner, total_rows):
    """Build the reduction kernel for a given static tiling."""

    def kernel(b_ref, tb_ref, g_ref, m_ref, t_ref, tmap_ref, tmask_ref, out_ref):
        c = pl.program_id(0)   # core split (parallel)
        i = pl.program_id(1)   # reduction steps (arbitrary)

        @pl.when(i == 0)
        def _():
            out_ref[...] = jnp.zeros_like(out_ref)

        # Row-validity mask: zeroes (a) the undefined tail of a partial block and
        # (b) whole blocks that only exist because of the 2-way core split.
        logical_block = c * n_inner + i
        row_start = logical_block * block_rows
        row_ids = row_start + jax.lax.broadcasted_iota(
            jnp.int32, (block_rows, LANES), 0)
        valid = (row_ids < total_rows).astype(jnp.float32)

        b = b_ref[...].astype(jnp.float32)
        tb = tb_ref[...].astype(jnp.float32)
        g = g_ref[...].astype(jnp.float32)
        t = t_ref[...].astype(jnp.float32)
        tmap = tmap_ref[...].astype(jnp.float32)
        # Every accumulated term carries either `m` or `tmask`, so masking these
        # two is sufficient for tail correctness.
        m = m_ref[...].astype(jnp.float32) * valid
        tmask = tmask_ref[...].astype(jnp.float32) * valid

        gm = g * m
        rows = jnp.concatenate(
            [
                jnp.sum(b * gm, axis=0, keepdims=True),                      # inter(binary)
                jnp.sum(b * m, axis=0, keepdims=True),                       # sum(binary*mask)
                jnp.sum(gm, axis=0, keepdims=True),                          # sum(gt*mask)
                jnp.sum(tb * gm, axis=0, keepdims=True),                     # inter(thresh_binary)
                jnp.sum(tb * m, axis=0, keepdims=True),                      # sum(thresh_binary*mask)
                jnp.sum(jnp.abs(t - tmap) * tmask, axis=0, keepdims=True),   # l1 numerator
                jnp.sum(tmask, axis=0, keepdims=True),                       # sum(thresh_mask)
                jnp.zeros((1, LANES), jnp.float32),
            ],
            axis=0,
        )
        # Single full-block accumulator update (no masked sub-slice stores).
        out_ref[...] += rows[None, :, :]

    return kernel


def _prep(x):
    """Flatten to 1-D, cast non-float dtypes to f32, view as (rows, 128)."""
    flat = x.reshape(-1)
    if not jnp.issubdtype(flat.dtype, jnp.floating):
        flat = flat.astype(jnp.float32)
    n = flat.shape[0]
    chunk = 8 * LANES
    padded = ((n + chunk - 1) // chunk) * chunk
    if padded != n:
        # Rare path (B*H*W not a multiple of 1024). Zero pad is numerically safe:
        # every sum term carries a mask factor that pads to zero.
        flat = jnp.pad(flat, (0, padded - n))
    return flat.reshape(padded // LANES, LANES)


def l1_dice_loss(pred, batch, eps=1e-6, l1_scale=10.0):
    binary = pred['binary'][:, 0]          # (B,1,H,W) -> (B,H,W)
    thresh_binary = pred['thresh_binary'][:, 0]
    thresh = pred['thresh'][:, 0]
    gt = batch['gt']
    if gt.ndim == 4:
        gt = gt[:, 0]
    mask = batch['mask']
    thresh_map = batch['thresh_map']
    thresh_mask = batch['thresh_mask']

    tiles = [_prep(a) for a in
             (binary, thresh_binary, gt, mask, thresh, thresh_map, thresh_mask)]
    total_rows = tiles[0].shape[0]          # multiple of 8 by construction

    block_rows = min(MAX_BLOCK_ROWS, total_rows)
    n_blocks = pl.cdiv(total_rows, block_rows)
    n_inner = pl.cdiv(n_blocks, NUM_CORES)

    def in_map(c, i):
        # Clamp so the DMA never targets a fully out-of-range block; the
        # in-kernel row mask zeroes rows that don't logically exist.
        return (jnp.minimum(c * n_inner + i, n_blocks - 1), 0)

    in_spec = pl.BlockSpec((block_rows, LANES), in_map)

    partial = pl.pallas_call(
        _make_kernel(block_rows, n_inner, total_rows),
        out_shape=jax.ShapeDtypeStruct((NUM_CORES, ACC_ROWS, LANES), jnp.float32),
        grid_spec=pltpu.PrefetchScalarGridSpec(
            num_scalar_prefetch=0,
            grid=(NUM_CORES, n_inner),
            in_specs=[in_spec] * 7,
            out_specs=pl.BlockSpec((1, ACC_ROWS, LANES), lambda c, i: (c, 0, 0)),
        ),
        compiler_params=pltpu.CompilerParams(
            dimension_semantics=("parallel", "arbitrary"),
            vmem_limit_bytes=32 * 1024 * 1024,
        ),
    )(*tiles)

    sums = jnp.sum(partial, axis=(0, 2))    # (8,): reduce cores + lanes
    inter_b, psum_b, gsum, inter_tb, psum_tb, l1_num, msum = (
        sums[0], sums[1], sums[2], sums[3], sums[4], sums[5], sums[6])

    main_loss = 1.0 - 2.0 * inter_b / (psum_b + gsum + eps)
    thresh_loss = 1.0 - 2.0 * inter_tb / (psum_tb + gsum + eps)
    dice_loss = main_loss + thresh_loss
    l1 = jnp.where(msum == 0, jnp.float32(0.0), l1_num / msum)
    loss = dice_loss + l1_scale * l1
    metrics = dict(main_loss=main_loss, thresh_loss=thresh_loss, l1_loss=l1)
    return loss, metrics


def _reference_loss(pred, batch, eps=1e-6, l1_scale=10.0):
    """Pure-JAX reproduction of the PyTorch module (for verification)."""
    b = pred['binary'][:, 0]
    tb = pred['thresh_binary'][:, 0]
    t = pred['thresh'][:, 0]
    g = batch['gt'][:, 0] if batch['gt'].ndim == 4 else batch['gt']
    m = batch['mask']
    main = 1.0 - 2.0 * jnp.sum(b * g * m) / (jnp.sum(b * m) + jnp.sum(g * m) + eps)
    th = 1.0 - 2.0 * jnp.sum(tb * g * m) / (jnp.sum(tb * m) + jnp.sum(g * m) + eps)
    msum = jnp.sum(batch['thresh_mask'])
    l1 = jnp.where(msum == 0, 0.0,
                   jnp.sum(jnp.abs(t - batch['thresh_map']) * batch['thresh_mask']) / msum)
    return main + th + l1_scale * l1


if __name__ == "__main__":
    key = jax.random.PRNGKey(0)
    B, H, W = 2, 32, 32
    ks = jax.random.split(key, 7)

    pred = {
        'binary': jax.nn.sigmoid(jax.random.normal(ks[0], (B, 1, H, W), jnp.float32)),
        'thresh_binary': jax.nn.sigmoid(jax.random.normal(ks[1], (B, 1, H, W), jnp.float32)),
        'thresh': jax.nn.sigmoid(jax.random.normal(ks[2], (B, 1, H, W), jnp.float32)),
    }
    batch = {
        'gt': (jax.random.uniform(ks[3], (B, 1, H, W)) > 0.5).astype(jnp.float32),
        'mask': (jax.random.uniform(ks[4], (B, H, W)) > 0.1).astype(jnp.float32),
        'thresh_map': jax.random.uniform(ks[5], (B, H, W), jnp.float32),
        'thresh_mask': (jax.random.uniform(ks[6], (B, H, W)) > 0.3).astype(jnp.float32),
    }

    loss, metrics = l1_dice_loss(pred, batch)
    loss = jax.block_until_ready(loss)

    ref = jax.block_until_ready(_reference_loss(pred, batch))
    assert jnp.allclose(loss, ref, rtol=1e-5, atol=1e-5), (loss, ref)

    print("KERNEL_OK")
</pallas_src>

<mosaic_0001>
module attributes {stable_mosaic.version = 11 : i64} {
  func.func @kernel(%arg0: i32, %arg1: i32, %arg2: memref<16x128xf32, #tpu.memory_space<vmem>>, %arg3: memref<16x128xf32, #tpu.memory_space<vmem>>, %arg4: memref<16x128xf32, #tpu.memory_space<vmem>>, %arg5: memref<16x128xf32, #tpu.memory_space<vmem>>, %arg6: memref<16x128xf32, #tpu.memory_space<vmem>>, %arg7: memref<16x128xf32, #tpu.memory_space<vmem>>, %arg8: memref<16x128xf32, #tpu.memory_space<vmem>>, %arg9: memref<1x8x128xf32, #tpu.memory_space<vmem>>) attributes {dimension_semantics = [#tpu.dimension_semantics<parallel>, #tpu.dimension_semantics<arbitrary>], iteration_bounds = array<i64: 2, 1>, scalar_prefetch = 0 : i64, scratch_operands = 0 : i64, tpu.core_type = #tpu.core_type<tc>, window_params = [{transform_indices = @transform_0, window_bounds = array<i64: 16, 128>}, {transform_indices = @transform_1, window_bounds = array<i64: 16, 128>}, {transform_indices = @transform_2, window_bounds = array<i64: 16, 128>}, {transform_indices = @transform_3, window_bounds = array<i64: 16, 128>}, {transform_indices = @transform_4, window_bounds = array<i64: 16, 128>}, {transform_indices = @transform_5, window_bounds = array<i64: 16, 128>}, {transform_indices = @transform_6, window_bounds = array<i64: 16, 128>}, {transform_indices = @transform_7, window_bounds = array<i64: 1, 8, 128>}]} {
    %c0_i32 = arith.constant 0 : i32
    %0 = arith.cmpi eq, %arg1, %c0_i32 : i32
    %1 = arith.extui %0 : i1 to i32
    %c0_i32_0 = arith.constant 0 : i32
    %2 = arith.cmpi ne, %1, %c0_i32_0 : i32
    scf.if %2 {
      %cst_28 = arith.constant 0.000000e+00 : f32
      %50 = vector.broadcast %cst_28 : f32 to vector<1x8x128xf32>
      %c0_29 = arith.constant 0 : index
      %c0_30 = arith.constant 0 : index
      %c0_31 = arith.constant 0 : index
      %51 = vector.load %arg9[%c0_29, %c0_30, %c0_31] : memref<1x8x128xf32, #tpu.memory_space<vmem>>, vector<1x8x128xf32>
      tpu.vector_store %arg9[%c0_29, %c0_30, %c0_31], %50 {strides = array<i32>} : memref<1x8x128xf32, #tpu.memory_space<vmem>>, vector<1x8x128xf32>,
    } else {
    }
    %c1_i32 = arith.constant 1 : i32
    %3 = arith.muli %arg0, %c1_i32 : i32
    %4 = arith.addi %3, %arg1 : i32
    %c16_i32 = arith.constant 16 : i32
    %5 = arith.muli %4, %c16_i32 : i32
    %6 = tpu.iota {dimensions = array<i32: 0>} : vector<16x128xi32>
    %7 = vector.broadcast %5 : i32 to vector<16x128xi32>
    %8 = arith.addi %7, %6 : vector<16x128xi32>
    %c16_i32_1 = arith.constant 16 : i32
    %9 = vector.broadcast %c16_i32_1 : i32 to vector<16x128xi32>
    %10 = arith.cmpi slt, %8, %9 : vector<16x128xi32>
    %11 = arith.extui %10 : vector<16x128xi1> to vector<16x128xi32>
    %12 = arith.sitofp %11 : vector<16x128xi32> to vector<16x128xf32>
    %c0 = arith.constant 0 : index
    %c0_2 = arith.constant 0 : index
    %13 = vector.load %arg2[%c0, %c0_2] : memref<16x128xf32, #tpu.memory_space<vmem>>, vector<16x128xf32>
    %c0_3 = arith.constant 0 : index
    %c0_4 = arith.constant 0 : index
    %14 = vector.load %arg3[%c0_3, %c0_4] : memref<16x128xf32, #tpu.memory_space<vmem>>, vector<16x128xf32>
    %c0_5 = arith.constant 0 : index
    %c0_6 = arith.constant 0 : index
    %15 = vector.load %arg4[%c0_5, %c0_6] : memref<16x128xf32, #tpu.memory_space<vmem>>, vector<16x128xf32>
    %c0_7 = arith.constant 0 : index
    %c0_8 = arith.constant 0 : index
    %16 = vector.load %arg6[%c0_7, %c0_8] : memref<16x128xf32, #tpu.memory_space<vmem>>, vector<16x128xf32>
    %c0_9 = arith.constant 0 : index
    %c0_10 = arith.constant 0 : index
    %17 = vector.load %arg7[%c0_9, %c0_10] : memref<16x128xf32, #tpu.memory_space<vmem>>, vector<16x128xf32>
    %c0_11 = arith.constant 0 : index
    %c0_12 = arith.constant 0 : index
    %18 = vector.load %arg5[%c0_11, %c0_12] : memref<16x128xf32, #tpu.memory_space<vmem>>, vector<16x128xf32>
    %19 = arith.mulf %18, %12 : vector<16x128xf32>
    %c0_13 = arith.constant 0 : index
    %c0_14 = arith.constant 0 : index
    %20 = vector.load %arg8[%c0_13, %c0_14] : memref<16x128xf32, #tpu.memory_space<vmem>>, vector<16x128xf32>
    %21 = arith.mulf %20, %12 : vector<16x128xf32>
    %22 = arith.mulf %15, %19 : vector<16x128xf32>
    %23 = arith.mulf %13, %22 : vector<16x128xf32>
    %cst = arith.constant dense<0.000000e+00> : vector<128xf32>
    %24 = vector.multi_reduction <add>, %23, %cst [0] : vector<16x128xf32> to vector<128xf32>
    %25 = vector.shape_cast %24 : vector<128xf32> to vector<1x128xf32>
    %26 = arith.mulf %13, %19 : vector<16x128xf32>
    %cst_15 = arith.constant dense<0.000000e+00> : vector<128xf32>
    %27 = vector.multi_reduction <add>, %26, %cst_15 [0] : vector<16x128xf32> to vector<128xf32>
    %28 = vector.shape_cast %27 : vector<128xf32> to vector<1x128xf32>
    %cst_16 = arith.constant dense<0.000000e+00> : vector<128xf32>
    %29 = vector.multi_reduction <add>, %22, %cst_16 [0] : vector<16x128xf32> to vector<128xf32>
    %30 = vector.shape_cast %29 : vector<128xf32> to vector<1x128xf32>
    %31 = arith.mulf %14, %22 : vector<16x128xf32>
    %cst_17 = arith.constant dense<0.000000e+00> : vector<128xf32>
    %32 = vector.multi_reduction <add>, %31, %cst_17 [0] : vector<16x128xf32> to vector<128xf32>
    %33 = vector.shape_cast %32 : vector<128xf32> to vector<1x128xf32>
    %34 = arith.mulf %14, %19 : vector<16x128xf32>
    %cst_18 = arith.constant dense<0.000000e+00> : vector<128xf32>
    %35 = vector.multi_reduction <add>, %34, %cst_18 [0] : vector<16x128xf32> to vector<128xf32>
    %36 = vector.shape_cast %35 : vector<128xf32> to vector<1x128xf32>
    %37 = arith.subf %16, %17 : vector<16x128xf32>
    %38 = math.absf %37 : vector<16x128xf32>
    %39 = arith.mulf %38, %21 : vector<16x128xf32>
    %cst_19 = arith.constant dense<0.000000e+00> : vector<128xf32>
    %40 = vector.multi_reduction <add>, %39, %cst_19 [0] : vector<16x128xf32> to vector<128xf32>
    %41 = vector.shape_cast %40 : vector<128xf32> to vector<1x128xf32>
    %cst_20 = arith.constant dense<0.000000e+00> : vector<128xf32>
    %42 = vector.multi_reduction <add>, %21, %cst_20 [0] : vector<16x128xf32> to vector<128xf32>
    %43 = vector.shape_cast %42 : vector<128xf32> to vector<1x128xf32>
    %cst_21 = arith.constant 0.000000e+00 : f32
    %44 = vector.broadcast %cst_21 : f32 to vector<1x128xf32>
    %45 = tpu.concatenate %25, %28, %30, %33, %36, %41, %43, %44 in 0 : vector<1x128xf32>, vector<1x128xf32>, vector<1x128xf32>, vector<1x128xf32>, vector<1x128xf32>, vector<1x128xf32>, vector<1x128xf32>, vector<1x128xf32> -> vector<8x128xf32>
    %c0_22 = arith.constant 0 : index
    %c0_23 = arith.constant 0 : index
    %c0_24 = arith.constant 0 : index
    %46 = vector.load %arg9[%c0_22, %c0_23, %c0_24] : memref<1x8x128xf32, #tpu.memory_space<vmem>>, vector<1x8x128xf32>
    %47 = vector.shape_cast %45 : vector<8x128xf32> to vector<1x8x128xf32>
    %48 = arith.addf %46, %47 : vector<1x8x128xf32>
    %c0_25 = arith.constant 0 : index
    %c0_26 = arith.constant 0 : index
    %c0_27 = arith.constant 0 : index
    %49 = vector.load %arg9[%c0_25, %c0_26, %c0_27] : memref<1x8x128xf32, #tpu.memory_space<vmem>>, vector<1x8x128xf32>
    tpu.vector_store %arg9[%c0_25, %c0_26, %c0_27], %48 {strides = array<i32>} : memref<1x8x128xf32, #tpu.memory_space<vmem>>, vector<1x8x128xf32>,
    return
  }
  func.func @transform_0(%arg0: i32, %arg1: i32) -> (i32, i32) {
    %c1_i32 = arith.constant 1 : i32
    %0 = arith.muli %arg0, %c1_i32 : i32
    %1 = arith.addi %0, %arg1 : i32
    %c0_i32 = arith.constant 0 : i32
    %2 = arith.minsi %1, %c0_i32 : i32
    %c0_i32_0 = arith.constant 0 : i32
    %c0_i32_1 = arith.constant 0 : i32
    return %2, %c0_i32_0 : i32, i32
  }
  func.func @transform_1(%arg0: i32, %arg1: i32) -> (i32, i32) {
    %c1_i32 = arith.constant 1 : i32
    %0 = arith.muli %arg0, %c1_i32 : i32
    %1 = arith.addi %0, %arg1 : i32
    %c0_i32 = arith.constant 0 : i32
    %2 = arith.minsi %1, %c0_i32 : i32
    %c0_i32_0 = arith.constant 0 : i32
    %c0_i32_1 = arith.constant 0 : i32
    return %2, %c0_i32_0 : i32, i32
  }
  func.func @transform_2(%arg0: i32, %arg1: i32) -> (i32, i32) {
    %c1_i32 = arith.constant 1 : i32
    %0 = arith.muli %arg0, %c1_i32 : i32
    %1 = arith.addi %0, %arg1 : i32
    %c0_i32 = arith.constant 0 : i32
    %2 = arith.minsi %1, %c0_i32 : i32
    %c0_i32_0 = arith.constant 0 : i32
    %c0_i32_1 = arith.constant 0 : i32
    return %2, %c0_i32_0 : i32, i32
  }
  func.func @transform_3(%arg0: i32, %arg1: i32) -> (i32, i32) {
    %c1_i32 = arith.constant 1 : i32
    %0 = arith.muli %arg0, %c1_i32 : i32
    %1 = arith.addi %0, %arg1 : i32
    %c0_i32 = arith.constant 0 : i32
    %2 = arith.minsi %1, %c0_i32 : i32
    %c0_i32_0 = arith.constant 0 : i32
    %c0_i32_1 = arith.constant 0 : i32
    return %2, %c0_i32_0 : i32, i32
  }
  func.func @transform_4(%arg0: i32, %arg1: i32) -> (i32, i32) {
    %c1_i32 = arith.constant 1 : i32
    %0 = arith.muli %arg0, %c1_i32 : i32
    %1 = arith.addi %0, %arg1 : i32
    %c0_i32 = arith.constant 0 : i32
    %2 = arith.minsi %1, %c0_i32 : i32
    %c0_i32_0 = arith.constant 0 : i32
    %c0_i32_1 = arith.constant 0 : i32
    return %2, %c0_i32_0 : i32, i32
  }
  func.func @transform_5(%arg0: i32, %arg1: i32) -> (i32, i32) {
    %c1_i32 = arith.constant 1 : i32
    %0 = arith.muli %arg0, %c1_i32 : i32
    %1 = arith.addi %0, %arg1 : i32
    %c0_i32 = arith.constant 0 : i32
    %2 = arith.minsi %1, %c0_i32 : i32
    %c0_i32_0 = arith.constant 0 : i32
    %c0_i32_1 = arith.constant 0 : i32
    return %2, %c0_i32_0 : i32, i32
  }
  func.func @transform_6(%arg0: i32, %arg1: i32) -> (i32, i32) {
    %c1_i32 = arith.constant 1 : i32
    %0 = arith.muli %arg0, %c1_i32 : i32
    %1 = arith.addi %0, %arg1 : i32
    %c0_i32 = arith.constant 0 : i32
    %2 = arith.minsi %1, %c0_i32 : i32
    %c0_i32_0 = arith.constant 0 : i32
    %c0_i32_1 = arith.constant 0 : i32
    return %2, %c0_i32_0 : i32, i32
  }
  func.func @transform_7(%arg0: i32, %arg1: i32) -> (i32, i32, i32) {
    %c0_i32 = arith.constant 0 : i32
    %c0_i32_0 = arith.constant 0 : i32
    %c0_i32_1 = arith.constant 0 : i32
    return %arg0, %c0_i32, %c0_i32_0 : i32, i32, i32
  }
}

</mosaic_0001>

<bundles_post_ra>
// kernel: tpu_custom_call.1
= control target key start
LH: loop header
LB: loop body
LE: loop exit
PB: predicated region body
PF: predicated region fallthrough
CT: control target
= control target key end

     0   :  { %s1825_s0 = inlined_call_operand.hbm [shape: f32[16,128], index: 0, kind: input, shape index: {}]   ;;  %s1826_s1 = inlined_call_operand.hbm [shape: f32[16,128], index: 1, kind: input, shape index: {}]   ;;  %s1827_s2 = inlined_call_operand.hbm [shape: f32[16,128], index: 2, kind: input, shape index: {}]   ;;  %s1828_s3 = inlined_call_operand.hbm [shape: f32[16,128], index: 3, kind: input, shape index: {}]   ;;  %s1829_s4 = inlined_call_operand.hbm [shape: f32[16,128], index: 4, kind: input, shape index: {}]   ;;  %s1830_s5 = inlined_call_operand.hbm [shape: f32[16,128], index: 5, kind: input, shape index: {}]   ;;  %s1831_s6 = inlined_call_operand.hbm [shape: f32[16,128], index: 6, kind: input, shape index: {}]   ;;  %s1832_s7 = inlined_call_operand.hbm [shape: f32[2,8,128], index: 7, kind: output, shape index: {}]  }
   0x1   :  { %1845 = sst [smem:[#allocation27_spill]] %s1832_s7 }
   0x2   :  { %12 = vsyncpa [#allocation3], 0 }
   0x3   :  { %14 = vsyncpa [#allocation3 + $0x1], 0 }
   0x4   :  { %15 = vsyncpa [#allocation6], 0 }
   0x5   :  { %17 = vsyncpa [#allocation6 + $0x1], 0 }
   0x6   :  { %18 = vsyncpa [#allocation9], 0 }
   0x7   :  { %20 = vsyncpa [#allocation9 + $0x1], 0 }
   0x8   :  { %21 = vsyncpa [#allocation12], 0 }
   0x9   :  { %23 = vsyncpa [#allocation12 + $0x1], 0 }
   0xa   :  { %24 = vsyncpa [#allocation4], 0 }
   0xb   :  { %26 = vsyncpa [#allocation4 + $0x1], 0  ;;  %s1500_s24 = smov 0   ;;  %s1502_s25 = smov 0  }
   0xc   :  { %s1504_s26 = smov 0   ;;  %s1506_s27 = smov 0  }
   0xd   :  { %s1508_s28 = smov 0   ;;  %s1510_s29 = smov 0  }
   0xe   :  { %s1512_s30 = smov 0   ;;  %s1514_s8 = smov 0  }
   0xf LB: > { %1846 = sst [smem:[#allocation20_spill]] %s1419_s24  ;;  %s1539_s9 = sadd.s32 4294967295, %s1447_s8   ;;  %s1447_s8 = sphi %s1514_s8, %s32_s8   ;;  %s1443_s30 = sphi %s1512_s30, %s1875_s30   ;;  %s1439_s29 = sphi %s1510_s29, %s1874_s29   ;;  %s1435_s28 = sphi %s1508_s28, %s1815_s28   ;;  %s1431_s27 = sphi %s1506_s27, %s1878_s27   ;;  %s1427_s26 = sphi %s1504_s26, %s1873_s26   ;;  %s1423_s25 = sphi %s1502_s25, %s1877_s25   ;;  %s1419_s24 = sphi %s1500_s24, %s1876_s24  }
  0x10   : > { %1847 = sst [smem:[#allocation21_spill]] %s1427_s26  ;;  %s972_s10 = sadd.s32 4294967294, %s1447_s8  }
  0x11   : > { %1848 = sst [smem:[#allocation22_spill]] %s1443_s30  ;;  %s44_s11 = sadd.s32 1, %s1443_s30 }
  0x12   : > { %p46_p0 = scmp.ge.s32.totalorder %s44_s11, 2  ;;  %p1416_p1 = scmp.ne.s32.totalorder %s1435_s28, 0 }
  0x13   : > { %p65_p2 = scmp.eq.s32.totalorder %s1447_s8, 0  ;;  %p70_p3 = scmp.ne.s32.totalorder %s1435_s28, %s1431_s27 }
  0x14   : > { %s1880_s11 = smov (%p46_p0, %s44_s11), 0  ;;  %p71_p5 = scmp.eq.s32.totalorder %s1539_s9, 0 }
  0x15   : > { %1849 = sst [smem:[#allocation23_spill]] %s1880_s11  ;;  %p1548_p4 = por %p1416_p1, %p65_p2 }
  0x16   : > { %p1553_p6 = por %p71_p5, %p70_p3  ;;  %s272_s14 = ssub.s32 %s1443_s30, %s1880_s11 }
  0x17   : > { %p273_p7 = scmp.eq.s32.totalorder %s272_s14, 0  ;;  %s275_s15 = sadd.s32 1, %s1427_s26 }
  0x18   : > { %s1851_s13 = scalar_select %p1553_p6, 1, 0 }
  0x19   : > { %s1561_s16 = scalar_select %p273_p7, %s1427_s26, %s275_s15  }
  0x1a   : > { %p285_p8 = scmp.ne.s32.totalorder %s1427_s26, %s1423_s25  ;;  %p286_p9 = scmp.eq.s32.totalorder %s1539_s9, 1 }
  0x1b   : > { %1852 = sst [smem:[#allocation24_spill]] %s1561_s16  ;;  %p291_p10 = scmp.ne.s32.totalorder %s1423_s25, %s1419_s24 }
  0x1c   : > { %p292_p11 = scmp.eq.s32.totalorder %s972_s10, 1  ;;  %p1568_p12 = por %p286_p9, %p285_p8 }
  0x1d   : > { %p1061_p1 = scmp.lt.s32.totalorder %s1447_s8, 2  ;;  %s1585_s20 = sand.u32 1, %s1447_s8  }
  0x1e   : > { %s1853_s17 = scalar_select %p1568_p12, 1, 0 }
  0x1f   : > { %p1573_p0 = por %p292_p11, %p291_p10  ;;  %p1580_p2 = pnand %p1061_p1, %p1548_p4 }
  0x20   : > { %1854 = sst [smem:[#allocation25_spill]] %s1853_s17  ;;  %s1449_s21 = smov [#allocation5]  }
  0x21   : > { %s1855_s18 = scalar_select %p1573_p0, 1, 0 }
  0x22   : > { %s350_s22 = sshll.u32 %s1449_s21, 4  ;;  %s1843_s23 = scalar_lea.sflag [#allocation6], %s1585_s20  ;;  %s351_s22 = int_to_ptr.vmem [resolvable:$true] %s350_s22 }
  0x23   : > { %1856 = sst [smem:[#allocation26_spill]] %s1855_s18  ;;  %s1138_s14 = scalar_lea.hbm %s1826_s1, 256 }
  0x24   : > { %p1139_p4 = scmp.ne.s32.totalorder %s1826_s1, %s1138_s14  ;;  %p1597_p5 = pneg %p1580_p2 }
  0x25   : > { %p1145_p9 = scmp.lt.s32.totalorder %s1138_s14, %s1138_s14 }
  0x26   : > { %p1141_p7 = pnand %p1597_p5, %p1139_p4 }
  0x28   : > { %p1142_p8 = pneg %p1141_p7 }
  0x2a   : > { %p1147_p10 = pnand %p1145_p9, %p1142_p8 }
  0x2c   : > { %1150 = shalt.err (!%p1147_p10)
}
  0x2d   : > { %s1151_s21 = scalar_lea.vmem %s351_s22, 256  ;;  %s1158_s11 = scalar_lea.vmem %s351_s22, 512 }
  0x2e   : > { %p1152_p11 = scmp.ne.s32.totalorder %s351_s22, %s1151_s21  ;;  %p1159_p3 = scmp.lt.s32.totalorder %s351_s22, %s351_s22 }
  0x2f   : > { %p1160_p0 = scmp.lt.s32.totalorder %s1158_s11, %s1151_s21 }
  0x30   : > { %p1154_p1 = pnand %p1152_p11, %p1597_p5 }
  0x31   : > { %p1161_p12 = por %p1160_p0, %p1159_p3 }
  0x32   : > { %p1155_p13 = pneg %p1154_p1 }
  0x34   : > { %p1162_p6 = pnand %p1161_p12, %p1155_p13 }
  0x36   : > { %1165 = shalt.err (!%p1162_p6)
}
  0x37   : > { %s1450_s27 = smov 128   ;;  %s1451_s10 = smov 8  }
  0x38   : > { %1041 = dma.hbm_to_vmem [thread:$0]  (!%p1580_p2), %s1826_s1, 256, %s351_s22, %s1843_s23, %s1450_s27, %s1450_s27, %s1451_s10  }
  0x39   : > { %p478_p0 = scmp.lt.s32.totalorder %s1447_s8, 3  ;;  %p1859_p12 = scmp.ge.s32.totalorder %s1447_s8, 1 }
  0x3a   : > { %s1452_s11 = smov [#allocation8]   ;;  %s385_s16 = scalar_lea.sflag [#allocation9], %s1585_s20 }
  0x3b   : > { %p1618_p6 = pnand %p1859_p12, %p478_p0  ;;  %s398_s30 = sshll.u32 %s1452_s11, 4  ;;  %s399_s30 = int_to_ptr.vmem [resolvable:$true] %s398_s30 }
  0x3c   : > { %s1166_s24 = scalar_lea.hbm %s1828_s3, 256 }
  0x3d   : > { %s1860_s21 = scalar_select %p1618_p6, 1, 0 }
  0x3e   : > { %p1167_p13 = scmp.ne.s32.totalorder %s1828_s3, %s1166_s24  ;;  %p1173_p7 = scmp.lt.s32.totalorder %s1166_s24, %s1166_s24 }
  0x40   : > { %p1169_p3 = pnand %p1167_p13, %p1597_p5 }
  0x42   : > { %p1170_p4 = pneg %p1169_p3 }
  0x44   : > { %p1175_p8 = pnand %p1173_p7, %p1170_p4 }
  0x46   : > { %1178 = shalt.err (!%p1175_p8)
}
  0x47   : > { %s1179_s22 = scalar_lea.vmem %s399_s30, 256  ;;  %s1186_s14 = scalar_lea.vmem %s399_s30, 512 }
  0x48   : > { %p1180_p9 = scmp.ne.s32.totalorder %s399_s30, %s1179_s22  ;;  %p1187_p1 = scmp.lt.s32.totalorder %s399_s30, %s399_s30 }
  0x49   : > { %p1188_p0 = scmp.lt.s32.totalorder %s1186_s14, %s1179_s22 }
  0x4a   : > { %p1182_p10 = pnand %p1180_p9, %p1597_p5 }
  0x4b   : > { %p1189_p12 = por %p1188_p0, %p1187_p1 }
  0x4c   : > { %p1183_p11 = pneg %p1182_p10 }
  0x4e   : > { %p1190_p6 = pnand %p1189_p12, %p1183_p11 }
  0x50   : > { %1193 = shalt.err (!%p1190_p6)
}
  0x51   : > { %1047 = dma.hbm_to_vmem [thread:$0]  (!%p1580_p2), %s1828_s3, 256, %s399_s30, %s385_s16, %s1450_s27, %s1450_s27, %s1451_s10  }
  0x52   : > { %s1453_s26 = smov [#allocation11]   ;;  %s1844_s18 = scalar_lea.sflag [#allocation12], %s1585_s20 }
  0x53   : > { %s446_s17 = sshll.u32 %s1453_s26, 4  ;;  %s1194_s22 = scalar_lea.hbm %s1830_s5, 256  ;;  %s447_s17 = int_to_ptr.vmem [resolvable:$true] %s446_s17 }
  0x54   : > { %p1195_p6 = scmp.ne.s32.totalorder %s1830_s5, %s1194_s22  ;;  %p1201_p4 = scmp.lt.s32.totalorder %s1194_s22, %s1194_s22 }
  0x56   : > { %p1197_p13 = pnand %p1195_p6, %p1597_p5 }
  0x58   : > { %p1198_p3 = pneg %p1197_p13 }
  0x5a   : > { %p1203_p7 = pnand %p1201_p4, %p1198_p3 }
  0x5c   : > { %1206 = shalt.err (!%p1203_p7)
}
  0x5d   : > { %s1207_s7 = scalar_lea.vmem %s447_s17, 256  ;;  %s1214_s30 = scalar_lea.vmem %s447_s17, 512 }
  0x5e   : > { %p1208_p8 = scmp.ne.s32.totalorder %s447_s17, %s1207_s7  ;;  %p1215_p11 = scmp.lt.s32.totalorder %s447_s17, %s447_s17 }
  0x5f   : > { %p1216_p1 = scmp.lt.s32.totalorder %s1214_s30, %s1207_s7 }
  0x60   : > { %p1210_p9 = pnand %p1208_p8, %p1597_p5 }
  0x61   : > { %p1217_p0 = por %p1216_p1, %p1215_p11 }
  0x62   : > { %p1211_p10 = pneg %p1210_p9 }
  0x64   : > { %p1218_p12 = pnand %p1217_p0, %p1211_p10 }
  0x66   : > { %1221 = shalt.err (!%p1218_p12)
}
  0x67   : > { %1053 = dma.hbm_to_vmem [thread:$0]  (!%p1580_p2), %s1830_s5, 256, %s447_s17, %s1844_s18, %s1450_s27, %s1450_s27, %s1451_s10  }
  0x68   : > { %s1454_s26 = smov [#allocation2]   ;;  %s1222_s14 = scalar_lea.hbm %s1825_s0, 256 }
  0x69   : > { %s326_s15 = sshll.u32 %s1454_s26, 4  ;;  %p1223_p6 = scmp.ne.s32.totalorder %s1825_s0, %s1222_s14  ;;  %s327_s15 = int_to_ptr.vmem [resolvable:$true] %s326_s15 }
  0x6a   : > { %p1229_p4 = scmp.lt.s32.totalorder %s1222_s14, %s1222_s14 }
  0x6b   : > { %p1225_p13 = pnand %p1223_p6, %p1597_p5 }
  0x6d   : > { %p1226_p3 = pneg %p1225_p13 }
  0x6f   : > { %p1231_p7 = pnand %p1229_p4, %p1226_p3 }
  0x71   : > { %1234 = shalt.err (!%p1231_p7)
}
  0x72   : > { %s1235_s23 = scalar_lea.vmem %s327_s15, 256  ;;  %s1242_s17 = scalar_lea.vmem %s327_s15, 512 }
  0x73   : > { %p1236_p8 = scmp.ne.s32.totalorder %s327_s15, %s1235_s23  ;;  %p1243_p11 = scmp.lt.s32.totalorder %s327_s15, %s327_s15 }
  0x74   : > { %p1244_p1 = scmp.lt.s32.totalorder %s1242_s17, %s1235_s23 }
  0x75   : > { %p1238_p9 = pnand %p1236_p8, %p1597_p5 }
  0x76   : > { %p1245_p0 = por %p1244_p1, %p1243_p11 }
  0x77   : > { %p1239_p10 = pneg %p1238_p9 }
  0x79   : > { %p1246_p12 = pnand %p1245_p0, %p1239_p10 }
  0x7b   : > { %1249 = shalt.err (!%p1246_p12)
}
  0x7c   : > { %1038 = dma.hbm_to_vmem [thread:$0]  (!%p1580_p2), %s1825_s0, 256, %s327_s15, [#allocation3], %s1450_s27, %s1450_s27, %s1451_s10  }
  0x7d   : > { %s1455_s11 = smov [#allocation7]   ;;  %s1250_s30 = scalar_lea.hbm %s1827_s2, 256 }
  0x7e   : > { %s374_s22 = sshll.u32 %s1455_s11, 4  ;;  %p1251_p6 = scmp.ne.s32.totalorder %s1827_s2, %s1250_s30  ;;  %s375_s22 = int_to_ptr.vmem [resolvable:$true] %s374_s22 }
  0x7f   : > { %p1257_p4 = scmp.lt.s32.totalorder %s1250_s30, %s1250_s30 }
  0x80   : > { %p1253_p13 = pnand %p1251_p6, %p1597_p5 }
  0x82   : > { %p1254_p3 = pneg %p1253_p13 }
  0x84   : > { %p1259_p7 = pnand %p1257_p4, %p1254_p3 }
  0x86   : > { %1262 = shalt.err (!%p1259_p7)
}
  0x87   : > { %s1263_s24 = scalar_lea.vmem %s375_s22, 256  ;;  %s1270_s15 = scalar_lea.vmem %s375_s22, 512 }
  0x88   : > { %p1264_p8 = scmp.ne.s32.totalorder %s375_s22, %s1263_s24  ;;  %p1271_p11 = scmp.lt.s32.totalorder %s375_s22, %s375_s22 }
  0x89   : > { %p1272_p1 = scmp.lt.s32.totalorder %s1270_s15, %s1263_s24 }
  0x8a   : > { %p1266_p9 = pnand %p1264_p8, %p1597_p5 }
  0x8b   : > { %p1273_p0 = por %p1272_p1, %p1271_p11 }
  0x8c   : > { %p1267_p10 = pneg %p1266_p9 }
  0x8e   : > { %p1274_p12 = pnand %p1273_p0, %p1267_p10 }
  0x90   : > { %1277 = shalt.err (!%p1274_p12)
}
  0x91   : > { %s1861_s26 = scalar_lea.sflag [#allocation6], %s1585_s20  ;;  %s1456_s7 = smov [#allocation10]  }
  0x92   : > { %1044 = dma.hbm_to_vmem [thread:$0]  (!%p1580_p2), %s1827_s2, 256, %s375_s22, %s1861_s26, %s1450_s27, %s1450_s27, %s1451_s10  }
  0x93   : > { %s422_s30 = sshll.u32 %s1456_s7, 4  ;;  %s1278_s24 = scalar_lea.hbm %s1829_s4, 256  ;;  %s423_s30 = int_to_ptr.vmem [resolvable:$true] %s422_s30 }
  0x94   : > { %p1279_p6 = scmp.ne.s32.totalorder %s1829_s4, %s1278_s24  ;;  %p1285_p4 = scmp.lt.s32.totalorder %s1278_s24, %s1278_s24 }
  0x96   : > { %p1281_p13 = pnand %p1279_p6, %p1597_p5 }
  0x98   : > { %p1282_p3 = pneg %p1281_p13 }
  0x9a   : > { %p1287_p7 = pnand %p1285_p4, %p1282_p3 }
  0x9c   : > { %1290 = shalt.err (!%p1287_p7)
}
  0x9d   : > { %s1291_s11 = scalar_lea.vmem %s423_s30, 256  ;;  %s1298_s22 = scalar_lea.vmem %s423_s30, 512 }
  0x9e   : > { %p1292_p8 = scmp.ne.s32.totalorder %s423_s30, %s1291_s11  ;;  %p1299_p11 = scmp.lt.s32.totalorder %s423_s30, %s423_s30 }
  0x9f   : > { %p1300_p1 = scmp.lt.s32.totalorder %s1298_s22, %s1291_s11 }
  0xa0   : > { %p1294_p9 = pnand %p1292_p8, %p1597_p5 }
  0xa1   : > { %p1301_p0 = por %p1300_p1, %p1299_p11 }
  0xa2   : > { %p1295_p10 = pneg %p1294_p9 }
  0xa4   : > { %p1302_p12 = pnand %p1301_p0, %p1295_p10 }
  0xa6   : > { %1305 = shalt.err (!%p1302_p12)
}
  0xa7   : > { %1050 = dma.hbm_to_vmem [thread:$0]  (!%p1580_p2), %s1829_s4, 256, %s423_s30, %s385_s16, %s1450_s27, %s1450_s27, %s1451_s10  }
  0xa8   : > { %s1457_s14 = smov [#allocation13]   ;;  %s1306_s24 = scalar_lea.hbm %s1831_s6, 256 }
  0xa9   : > { %s470_s7 = sshll.u32 %s1457_s14, 4  ;;  %p1307_p6 = scmp.ne.s32.totalorder %s1831_s6, %s1306_s24  ;;  %s471_s7 = int_to_ptr.vmem [resolvable:$true] %s470_s7 }
  0xaa   : > { %p1313_p4 = scmp.lt.s32.totalorder %s1306_s24, %s1306_s24 }
  0xab   : > { %p1309_p13 = pnand %p1307_p6, %p1597_p5 }
  0xad   : > { %p1310_p3 = pneg %p1309_p13 }
  0xaf   : > { %p1315_p7 = pnand %p1313_p4, %p1310_p3 }
  0xb1   : > { %1318 = shalt.err (!%p1315_p7)
}
  0xb2   : > { %s1319_s22 = scalar_lea.vmem %s471_s7, 256  ;;  %s1326_s16 = scalar_lea.vmem %s471_s7, 512 }
  0xb3   : > { %p1320_p8 = scmp.ne.s32.totalorder %s471_s7, %s1319_s22  ;;  %p1327_p11 = scmp.lt.s32.totalorder %s471_s7, %s471_s7 }
  0xb4   : > { %p1328_p1 = scmp.lt.s32.totalorder %s1326_s16, %s1319_s22 }
  0xb5   : > { %p1322_p9 = pnand %p1320_p8, %p1597_p5 }
  0xb6   : > { %p1329_p0 = por %p1328_p1, %p1327_p11 }
  0xb7   : > { %p1323_p10 = pneg %p1322_p9 }
  0xb9   : > { %p1330_p12 = pnand %p1329_p0, %p1323_p10 }
  0xbb   : > { %1333 = shalt.err (!%p1330_p12)
}
  0xbc   : > { %s1862_s30 = scalar_lea.sflag [#allocation12], %s1585_s20  ;;  %p1863_p5 = scmp.ne.s32.totalorder %s1860_s21, 0 }
  0xbd   : > { %1056 = dma.hbm_to_vmem [thread:$0]  (!%p1580_p2), %s1831_s6, 256, %s471_s7, %s1862_s30, %s1450_s27, %s1450_s27, %s1451_s10  }
  0xbe   : > { %482 = sbr.rel (%p1863_p5) target bundleno = 255 (0xff), region = 48  ;;  %s484_s12 = sand.u32 (!%p1863_p5), 1, %s1435_s28  }
  0xbf   : > { %s1745_s14 = sshll.u32 (!%p1863_p5), %s484_s12, 4  ;;  %s485_s23 = scalar_lea.sflag (!%p1863_p5), [#allocation3], %s484_s12 }
  0xc0   : > { %s488_s19 = scalar_lea.vmem (!%p1863_p5), [#allocation2], %s1745_s14  ;;  %p1864_p6 = scmp.ne.s32.totalorder (!%p1863_p5), %s1851_s13, 0 }
  0xc3   : > { %1397 = dma.done.wait (%p1864_p6), %s485_s23, 256  }
  0xc4   : > { %1399 = vsyncadd (%p1864_p6), %s485_s23, 4294967040  ;;  %s493_s20 = sand.u32 1, %s1539_s9   ;;  %s497_s10 = scalar_lea.vmem [#allocation5], %s1745_s14 }
  0xc5   : > { %s494_s27 = scalar_lea.sflag [#allocation6], %s493_s20 }
  0xc6   : > { %1401 = dma.done.wait (%p1864_p6), %s494_s27, 512  }
  0xc7   : > { %1403 = vsyncadd (%p1864_p6), %s494_s27, 4294966784  ;;  %s506_s21 = scalar_lea.vmem [#allocation7], %s1745_s14  ;;  %s512_s7 = scalar_lea.sflag [#allocation9], %s493_s20 }
  0xc8   : > { %s515_s17 = scalar_lea.vmem [#allocation8], %s1745_s14 }
  0xc9   : > { %1405 = dma.done.wait (%p1864_p6), %s512_s7, 512  }
  0xca   : > { %1407 = vsyncadd (%p1864_p6), %s512_s7, 4294966784  ;;  %s524_s9 = scalar_lea.vmem [#allocation10], %s1745_s14  ;;  %s530_s24 = scalar_lea.sflag [#allocation12], %s493_s20 }
  0xcb   : > { %s533_s15 = scalar_lea.vmem [#allocation11], %s1745_s14 }
  0xcc   : > { %1409 = dma.done.wait (%p1864_p6), %s530_s24, 512  }
  0xcd   : > { %1411 = vsyncadd (%p1864_p6), %s530_s24, 4294966784  ;;  %v638_v0 = vlaneseq  ;;  %s1005_s11 = sshll.u32 %s1439_s29, 4  ;;  %v1458_v6 = vmov 0.0   ;;  %v650_v8 = vld [vmem:[%s488_s19] sm:$0xff]  ;;  %v651_v9 = vld [vmem:[%s488_s19 + $0x8] sm:$0xff]  ;;  %s542_s13 = scalar_lea.vmem [#allocation13], %s1745_s14 }
  0xce   : > { %v641_v2 = vstv %s1005_s11  ;;  %v654_v10 = vld [vmem:[%s506_s21] sm:$0xff]  ;;  %v655_v11 = vld [vmem:[%s506_s21 + $0x8] sm:$0xff]  ;;  %s600_s22 = sand.u32 1, %s1423_s25   ;;  %vm733_vm2 = vcmask 1040384   ;;  %vm735_vm3 = vcmask 1041408   ;;  %vm737_vm4 = vcmask 1042432  }
  0xcf   : > { %v639_v1 = vshrl.u32 %v638_v0, 7  ;;  %v652_v13 = vld [vmem:[%s497_s10] sm:$0xff]  ;;  %v657_v15 = vld [vmem:[%s524_s9 + $0x8] sm:$0xff]  ;;  %s1004_s16 = sshll.u32 %s600_s22, 3  ;;  %vm739_vm5 = vcmask 1043456   ;;  %vm741_vm6 = vcmask 1044480  }
  0xd0   : > { %v656_v14 = vld [vmem:[%s524_s9] sm:$0xff]  ;;  %v659_v17 = vld [vmem:[%s533_s15 + $0x8] sm:$0xff]  ;;  %s1865_s30 = sld [smem:[#allocation25_spill]]  ;;  %vm743_vm7 = vcmask 1045504   ;;  %vm745_vm8 = vcmask 1046528   ;;  %s1009_s18 = sshll.u32 %s1439_s29, 7 }
  0xd1   : > { %v640_v3 = vadd.s32 8, %v639_v1  ;;  %v642_v4 = vadd.s32 %v641_v2, %v639_v1  ;;  %v658_v16 = vld [vmem:[%s533_s15] sm:$0xff]  ;;  %v661_v19 = vld [vmem:[%s515_s17 + $0x8] sm:$0xff]  ;;  %v714_v26 = vsub.f32 %v657_v15, %v659_v17  ;;  %s602_s26 = scalar_lea.vmem [#allocation14], %s1004_s16  ;;  %s1866_s19 = sld [smem:[#allocation27_spill]] }
  0xd2   : > { %v660_v18 = vld [vmem:[%s515_s17] sm:$0xff]  ;;  %v713_v20 = vsub.f32 %v656_v14, %v658_v16  ;;  %v653_v21 = vld [vmem:[%s497_s10 + $0x8] sm:$0xff]  ;;  %s764_s12 = sshll.u32 %s602_s26, 4  ;;  %s751_s27 = scalar_lea.sflag [#allocation4], %s600_s22  ;;  %s765_s12 = int_to_ptr.vmem [resolvable:$true] %s764_s12 }
  0xd3   : > { %v643_v5 = vadd.s32 %v641_v2, %v640_v3  ;;  %vm644_vm0 = vcmp.lt.s32.totalorder %v642_v4, 16  ;;  %v664_v24 = vld [vmem:[%s542_s13] sm:$0xff]  ;;  %v665_v25 = vld [vmem:[%s542_s13 + $0x8] sm:$0xff]  ;;  %v716_v36 = vand.u32 2147483647, %v714_v26  ;;  %s1334_s10 = scalar_lea.vmem %s765_s12, 128 }
  0xd4   : > { %v1006_v7 = vsel %vm644_vm0, 1.0, %v1458_v6  ;;  %v715_v29 = vand.u32 2147483647, %v713_v20  ;;  %p1335_p2 = scmp.ne.s32.totalorder %s765_s12, %s1334_s10  ;;  %s1459_s21 = smov [#allocation14]  }
  0xd5   : > { %vm645_vm1 = vcmp.lt.s32.totalorder %v643_v5, 16  ;;  %v662_v22 = vmul.f32 %v1006_v7, %v660_v18  ;;  %v666_v27 = vmul.f32 %v1006_v7, %v664_v24  ;;  %s1338_s7 = sshll.u32 %s1459_s21, 4  ;;  %s1339_s7 = int_to_ptr.vmem [resolvable:$false] %s1338_s7 }
  0xd6   : > { %v1007_v12 = vsel %vm645_vm1, 1.0, %v1458_v6  ;;  %p1867_p13 = scmp.ne.s32.totalorder %s1865_s30, 0  ;;  %s1340_s29 = scalar_lea.vmem %s1339_s7, 256 }
  0xd7   : > { %v663_v23 = vmul.f32 %v1007_v12, %v661_v19  ;;  %v667_v28 = vmul.f32 %v1007_v12, %v665_v25  ;;  %v668_v30 = vmul.f32 %v662_v22, %v654_v10  ;;  %v679_v32 = vmul.f32 %v662_v22, %v650_v8  ;;  %s762_s20 = scalar_lea.hbm %s1866_s19, %s1009_s18  ;;  %p1341_p7 = scmp.lt.s32.totalorder %s765_s12, %s1339_s7 }
  0xd8   : > { %v704_v34 = vmul.f32 %v662_v22, %v652_v13  ;;  %v717_v37 = vmul.f32 %v715_v29, %v666_v27  ;;  %p1336_p3 = pnand %p1335_p2, %p1867_p13  ;;  %p1342_p8 = scmp.lt.s32.totalorder %s1340_s29, %s1334_s10 }
  0xd9   : > { %v669_v31 = vmul.f32 %v663_v23, %v655_v11  ;;  %v680_v33 = vmul.f32 %v663_v23, %v651_v9  ;;  %v705_v35 = vmul.f32 %v663_v23, %v653_v21  ;;  %v670_v38 = vmul.f32 %v668_v30, %v650_v8 }
  0xda   : > { %v695_v42 = vmul.f32 %v668_v30, %v652_v13  ;;  %v718_v45 = vmul.f32 %v716_v36, %v667_v28  ;;  %v726_v49 = vadd.f32 %v667_v28, %v666_v27  ;;  %p1337_p4 = pneg %p1336_p3  ;;  %p1343_p9 = por %p1342_p8, %p1341_p7 }
  0xdb   : > { %v671_v39 = vmul.f32 %v669_v31, %v651_v9  ;;  %v681_v40 = vadd.f32 %v680_v33, %v679_v32  ;;  %v688_v41 = vadd.f32 %v669_v31, %v668_v30  ;;  %v696_v43 = vmul.f32 %v669_v31, %v653_v21 }
  0xdc   : > { %v706_v44 = vadd.f32 %v705_v35, %v704_v34  ;;  %v719_v52 = vadd.f32 %v718_v45, %v717_v37  ;;  %v727_v56 = vrot.slane %v726_v49, 4  ;;  %p1344_p10 = pnand %p1343_p9, %p1337_p4 }
  0xdd   : > { %v672_v46 = vadd.f32 %v671_v39, %v670_v38  ;;  %v682_v47 = vrot.slane %v681_v40, 4  ;;  %v689_v48 = vrot.slane %v688_v41, 4  ;;  %v697_v50 = vadd.f32 %v696_v43, %v695_v42 }
  0xde   : > { %v707_v51 = vrot.slane %v706_v44, 4  ;;  %v720_v59 = vrot.slane %v719_v52, 4  ;;  %v728_v63 = vadd.f32 %v727_v56, %v726_v49 }
  0xdf   : > { %v673_v53 = vrot.slane %v672_v46, 4  ;;  %v683_v54 = vadd.f32 %v682_v47, %v681_v40  ;;  %v690_v55 = vadd.f32 %v689_v48, %v688_v41  ;;  %v698_v57 = vrot.slane %v697_v50, 4 }
  0xe0   : > { %v708_v58 = vadd.f32 %v707_v51, %v706_v44  ;;  %v721_v2 = vadd.f32 %v720_v59, %v719_v52  ;;  %v729_v6 = vrot.slane %v728_v63, 2 }
  0xe1   : > { %v674_v60 = vadd.f32 %v673_v53, %v672_v46  ;;  %v684_v61 = vrot.slane %v683_v54, 2  ;;  %v691_v62 = vrot.slane %v690_v55, 2  ;;  %v699_v0 = vadd.f32 %v698_v57, %v697_v50 }
  0xe2   : > { %v709_v1 = vrot.slane %v708_v58, 2  ;;  %v722_v9 = vrot.slane %v721_v2, 2  ;;  %v730_v13 = vadd.f32 %v729_v6, %v728_v63 }
  0xe3   : > { %v675_v3 = vrot.slane %v674_v60, 2  ;;  %v685_v4 = vadd.f32 %v684_v61, %v683_v54  ;;  %v692_v5 = vadd.f32 %v691_v62, %v690_v55  ;;  %v700_v7 = vrot.slane %v699_v0, 2 }
  0xe4   : > { %v710_v8 = vadd.f32 %v709_v1, %v708_v58  ;;  %v723_v16 = vadd.f32 %v722_v9, %v721_v2  ;;  %v731_v22 = vrot.slane %v730_v13, 1 }
  0xe5   : > { %v676_v10 = vadd.f32 %v675_v3, %v674_v60  ;;  %v686_v11 = vrot.slane %v685_v4, 1  ;;  %v693_v12 = vrot.slane %v692_v5, 1  ;;  %v701_v14 = vadd.f32 %v700_v7, %v699_v0 }
  0xe6   : > { %v711_v15 = vrot.slane %v710_v8, 1  ;;  %v724_v21 = vrot.slane %v723_v16, 1  ;;  %v732_v28 = vadd.f32 %v731_v22, %v730_v13 }
  0xe7   : > { %v677_v17 = vrot.slane %v676_v10, 1  ;;  %v687_v18 = vadd.f32 %v686_v11, %v685_v4  ;;  %v694_v19 = vadd.f32 %v693_v12, %v692_v5  ;;  %v702_v20 = vrot.slane %v701_v14, 1 }
  0xe8   : > { %v712_v25 = vadd.f32 %v711_v15, %v710_v8  ;;  %v725_v26 = vadd.f32 %v724_v21, %v723_v16 }
  0xe9   : > { %v678_v23 = vadd.f32 %v677_v17, %v676_v10  ;;  %v703_v24 = vadd.f32 %v702_v20, %v701_v14 }
  0xeb   : > { %v734_v27 = vsel %vm733_vm2, %v678_v23, %v687_v18 }
  0xec   : > { %v736_v29 = vsel %vm735_vm3, %v734_v27, %v694_v19 }
  0xed   : > { %v738_v30 = vsel %vm737_vm4, %v736_v29, %v703_v24 }
  0xee   : > { %v740_v31 = vsel %vm739_vm5, %v738_v30, %v712_v25 }
  0xef   : > { %v742_v32 = vsel %vm741_vm6, %v740_v31, %v725_v26 }
  0xf0   : > { %v744_v33 = vsel %vm743_vm7, %v742_v32, %v732_v28 }
  0xf1   : > { %v746_v34 = vsel %vm745_vm8, %v744_v33, 0.0 }
  0xf2   : > { %749 = vst [vmem:[%s602_s26] sm:$0xff] %v746_v34 }
  0xf3   : > { %1347 = shalt.err (!%p1344_p10)
}
  0xf4   : > { %s1348_s17 = scalar_lea.hbm %s762_s20, 128  ;;  %s1352_s15 = scalar_lea.hbm %s1866_s19, 256 }
  0xf5   : > { %p1349_p11 = scmp.ne.s32.totalorder %s762_s20, %s1348_s17  ;;  %p1353_p12 = scmp.lt.s32.totalorder %s762_s20, %s1866_s19 }
  0xf6   : > { %p1354_p5 = scmp.lt.s32.totalorder %s1352_s15, %s1348_s17 }
  0xf7   : > { %p1350_p1 = pnand %p1349_p11, %p1867_p13 }
  0xf8   : > { %p1355_p6 = por %p1354_p5, %p1353_p12 }
  0xf9   : > { %p1351_p0 = pneg %p1350_p1 }
  0xfb   : > { %p1356_p2 = pnand %p1355_p6, %p1351_p0 }
  0xfd   : > { %1359 = shalt.err (!%p1356_p2)
}
  0xfe   : > { %1033 = dma.vmem_to_hbm [thread:$0]  (%p1867_p13), %s765_s12, 128, %s762_s20, %s751_s27  }
  0xff PF: > { %s1868_s22 = sld [smem:[#allocation20_spill]]  ;;  %p1871_p4 = scmp.ge.s32.totalorder %s1447_s8, 2 }
 0x100   : > { %s1869_s16 = sld [smem:[#allocation26_spill]] }
 0x105   : > { %s776_s18 = sand.u32 1, %s1868_s22  }
 0x106   : > { %p1870_p3 = scmp.ne.s32.totalorder %s1869_s16, 0  ;;  %s777_s26 = scalar_lea.sflag [#allocation4], %s776_s18 }
 0x108   : > { %p1058_p7 = pnand %p1871_p4, %p1870_p3 }
 0x10a   : > { %p1059_p8 = pneg %p1058_p7 }
 0x10c   : > { %1413 = dma.done.wait (%p1059_p8), %s777_s26, 128  }
 0x10d   : > { %1415 = vsyncadd (%p1059_p8), %s777_s26, 4294967168  ;;  %s32_s8 = sadd.s32 1, %s1447_s8   ;;  %s1872_s14 = sld [smem:[#allocation21_spill]] }
 0x10e   : > { %p29_p9 = scmp.ge.s32.totalorder %s32_s8, 4   ;;  %s1873_s26 = sld [smem:[#allocation24_spill]] }
 0x10f   : > { %s1874_s29 = sld [smem:[#allocation22_spill]]  ;;  %s1876_s24 = smov %s1423_s25 }
 0x110   : > { %s1875_s30 = sld [smem:[#allocation23_spill]]  ;;  %s1878_s27 = smov %s1435_s28 }
 0x111   : > { %s1815_s28 = smov 0   ;;  %31 = sbr.rel (!%p29_p9) target bundleno = 15 (0xf), region = 169 }
 0x113   : > { %s1877_s25 = smov %s1872_s14 }
 0x116   :  { %782 = vsyncpa [#allocation3], 1 }
 0x117   :  { %784 = vsyncpa [#allocation3 + $0x1], 1 }
 0x118   :  { %785 = vsyncpa [#allocation6], 1 }
 0x119   :  { %787 = vsyncpa [#allocation6 + $0x1], 1 }
 0x11a   :  { %788 = vsyncpa [#allocation9], 1 }
 0x11b   :  { %790 = vsyncpa [#allocation9 + $0x1], 1 }
 0x11c   :  { %791 = vsyncpa [#allocation12], 1 }
 0x11d   :  { %793 = vsyncpa [#allocation12 + $0x1], 1 }
 0x11e   :  { %794 = vsyncpa [#allocation4], 1 }
 0x11f   :  { %796 = vsyncpa [#allocation4 + $0x1], 1 }

</bundles_post_ra>
